<compile_context>
chip_gen: v5e
topology: v5e:2x2
jax: 0.10.0
libtpu: 0.0.40
codegen_flags: <defaults>
</compile_context>

<pallas_src>
import functools

import jax
import jax.numpy as jnp
from jax.experimental import pallas as pl
from jax.experimental.pallas import tpu as pltpu

EPS = 1e-5


def _round_up(a: int, b: int) -> int:
    return (a + b - 1) // b * b


def _make_kn_conv_kernel(cout, kh, kw, wp, lout, k):
    inv_k = 1.0 / float(k)

    def kernel(x_ref, w_ref, wsum_ref, b_ref, o_ref):
        # x_ref:    (1, Cin, Lin)   zero-padded input image, spatial flattened (y*Wp + x) on lanes
        # w_ref:    (kh*kw, Cout, Cin) per-tap weight slices
        # wsum_ref: (Cout, 1)       sum of each filter over (Cin, kh, kw)
        # b_ref:    (Cout, 1)       bias
        # o_ref:    (1, Cout, Lout) output, same flat (y*Wp + x) indexing
        r = jnp.maximum(x_ref[0], 0.0)                      # fused ReLU; relu(0)=0 keeps zero-padding exact

        acc = jnp.zeros((cout, lout), jnp.float32)          # W @ p   (conv of relu'd input)
        s1 = jnp.zeros((1, lout), jnp.float32)              # sum_K p     (per window)
        s2 = jnp.zeros((1, lout), jnp.float32)              # sum_K p^2   (per window)
        for dy in range(kh):
            for dx in range(kw):
                t = dy * kw + dx
                s = dy * wp + dx                            # window offset == lane shift on flat axis
                tap = r[:, s:s + lout]                      # (Cin, Lout) static shifted slice
                acc = acc + jnp.dot(w_ref[t], tap, preferred_element_type=jnp.float32)
                s1 = s1 + jnp.sum(tap, axis=0, keepdims=True)
                s2 = s2 + jnp.sum(tap * tap, axis=0, keepdims=True)

        mu = s1 * inv_k
        var = jnp.maximum(s2 * inv_k - mu * mu, 0.0)        # clamp: one-pass var can go slightly negative
        inv_std = jax.lax.rsqrt(var + EPS)                  # (1, Lout), EUP rsqrt

        # normalization folded into the matmul: W @ ((p - mu) * inv) == (W@p - Wsum*mu) * inv
        out = (acc - wsum_ref[...] * mu) * inv_std + b_ref[...]
        o_ref[0] = out.astype(o_ref.dtype)

    return kernel


@functools.partial(jax.jit, static_argnames=("padding",))
def conv_block_kn(x_nchw, weight, bias, padding):
    """x_nchw: (N, Cin, H, W); weight: (Cout, Cin, 2, 2); bias: (Cout,). Returns NCHW."""
    N, Cin, H, W = x_nchw.shape
    Cout, _, kh, kw = weight.shape
    ph, pw = padding
    Hp, Wp = H + 2 * ph, W + 2 * pw
    Ho, Wo = Hp - (kh - 1), Wp - (kw - 1)
    K = Cin * kh * kw

    # flat working lengths (lane axis), padded to multiples of 128 for dense vregs/stores
    lout = _round_up(Ho * Wp, 128)                          # output positions kept per image
    lin = _round_up(lout + (kh - 1) * Wp + (kw - 1), 128)   # input slab long enough for max shift

    # --- glue: zero-pad + flatten spatial (no duplication, no transpose) ---
    xp = jnp.pad(x_nchw.astype(jnp.float32), ((0, 0), (0, 0), (ph, ph), (pw, pw)))
    x_flat = xp.reshape(N, Cin, Hp * Wp)
    x_flat = jnp.pad(x_flat, ((0, 0), (0, 0), (0, lin - Hp * Wp)))

    # per-tap weight slices: w_taps[dy*kw+dx] = weight[:, :, dy, dx]  -> (kh*kw, Cout, Cin)
    w_taps = jnp.transpose(weight.astype(jnp.float32), (2, 3, 0, 1)).reshape(kh * kw, Cout, Cin)
    w_sum = jnp.sum(weight.astype(jnp.float32), axis=(1, 2, 3)).reshape(Cout, 1)
    b2 = bias.astype(jnp.float32).reshape(Cout, 1)

    kernel = _make_kn_conv_kernel(Cout, kh, kw, Wp, lout, K)

    out_flat = pl.pallas_call(
        kernel,
        out_shape=jax.ShapeDtypeStruct((N, Cout, lout), jnp.float32),
        grid=(N,),
        in_specs=[
            pl.BlockSpec((1, Cin, lin), lambda n: (n, 0, 0)),
            pl.BlockSpec((kh * kw, Cout, Cin), lambda n: (0, 0, 0)),
            pl.BlockSpec((Cout, 1), lambda n: (0, 0)),
            pl.BlockSpec((Cout, 1), lambda n: (0, 0)),
        ],
        out_specs=pl.BlockSpec((1, Cout, lout), lambda n: (n, 0, 0)),
        compiler_params=pltpu.CompilerParams(dimension_semantics=("parallel",)),
    )(x_flat, w_taps, w_sum, b2)

    # epilogue: output is already (N, Cout, y*Wp + x) == NCHW over the padded width;
    # just drop the invalid wrap-around columns (cheap, output-sized slice; no transpose).
    out = out_flat[:, :, :Ho * Wp].reshape(N, Cout, Ho, Wp)[:, :, :, :Wo]
    return out


def _reference(x_nchw, weight, bias, padding):
    """Pure-JAX reference of the same semantics (for validation)."""
    N, Cin, H, W = x_nchw.shape
    Cout, _, kh, kw = weight.shape
    ph, pw = padding
    Ho = H + 2 * ph - (kh - 1)
    Wo = W + 2 * pw - (kw - 1)
    xp = jnp.pad(jnp.maximum(x_nchw, 0.0), ((0, 0), (0, 0), (ph, ph), (pw, pw)))
    taps = [xp[:, :, dy:dy + Ho, dx:dx + Wo] for dy in range(kh) for dx in range(kw)]
    cols = jnp.stack(taps, axis=2)                                    # (N, Cin, K_taps, Ho, Wo)
    cols = jnp.transpose(cols, (0, 3, 4, 1, 2)).reshape(N * Ho * Wo, Cin * kh * kw)
    mu = jnp.mean(cols, axis=1, keepdims=True)
    var = jnp.var(cols, axis=1, keepdims=True)
    p_hat = (cols - mu) * jax.lax.rsqrt(var + EPS)
    w_flat = jnp.transpose(weight, (1, 2, 3, 0)).reshape(Cin * kh * kw, Cout)
    out = p_hat @ w_flat + bias[None, :]
    return jnp.transpose(out.reshape(N, Ho, Wo, Cout), (0, 3, 1, 2))


if __name__ == "__main__":
    key = jax.random.PRNGKey(0)
    k_x, k_w, k_b = jax.random.split(key, 3)

    N, Cin, H, W = 2, 4, 16, 16
    Cout = 8
    padding = (1, 1)

    x = jax.random.normal(k_x, (N, Cin, H, W), dtype=jnp.float32)
    # deterministic parameter init (Conv2d-like uniform fan-in scale)
    fan_in = Cin * 2 * 2
    bound = 1.0 / (fan_in ** 0.5)
    weight = jax.random.uniform(k_w, (Cout, Cin, 2, 2), jnp.float32, -bound, bound)
    bias = jax.random.uniform(k_b, (Cout,), jnp.float32, -bound, bound)

    out = conv_block_kn(x, weight, bias, padding)
    out = jax.block_until_ready(out)

    ref = _reference(x, weight, bias, padding)
    assert out.shape == (N, Cout, H + 1, W + 1), out.shape
    # tolerance 1e-3: kernel uses the algebraically-folded normalization + one-pass variance,
    # which reassociates f32 math relative to the straightforward reference.
    assert jnp.allclose(out, ref, atol=1e-3, rtol=1e-3), float(jnp.max(jnp.abs(out - ref)))

    print("KERNEL_OK")
</pallas_src>

<mosaic_0001>
module attributes {stable_mosaic.version = 11 : i64} {
  func.func @kernel(%arg0: i32, %arg1: memref<1x4x512xf32, #tpu.memory_space<vmem>>, %arg2: memref<4x8x4xf32, #tpu.memory_space<vmem>>, %arg3: memref<8x1xf32, #tpu.memory_space<vmem>>, %arg4: memref<8x1xf32, #tpu.memory_space<vmem>>, %arg5: memref<1x8x384xf32, #tpu.memory_space<vmem>>) attributes {dimension_semantics = [#tpu.dimension_semantics<parallel>], iteration_bounds = array<i64: 2>, scalar_prefetch = 0 : i64, scratch_operands = 0 : i64, tpu.core_type = #tpu.core_type<tc>, window_params = [{transform_indices = @transform_0, window_bounds = array<i64: 1, 4, 512>}, {pipeline_mode = #tpu.pipeline_mode<synchronous>, transform_indices = @transform_1, window_bounds = array<i64: 4, 8, 4>}, {pipeline_mode = #tpu.pipeline_mode<synchronous>, transform_indices = @transform_2, window_bounds = array<i64: 8, 1>}, {pipeline_mode = #tpu.pipeline_mode<synchronous>, transform_indices = @transform_3, window_bounds = array<i64: 8, 1>}, {transform_indices = @transform_4, window_bounds = array<i64: 1, 8, 384>}]} {
    %c0 = arith.constant 0 : index
    %c0_0 = arith.constant 0 : index
    %c0_1 = arith.constant 0 : index
    %0 = vector.load %arg1[%c0, %c0_0, %c0_1] : memref<1x4x512xf32, #tpu.memory_space<vmem>>, vector<1x4x512xf32>
    %1 = vector.shape_cast %0 : vector<1x4x512xf32> to vector<4x512xf32>
    %cst = arith.constant 0.000000e+00 : f32
    %2 = vector.broadcast %cst : f32 to vector<4x512xf32>
    %3 = arith.maximumf %1, %2 : vector<4x512xf32>
    %cst_2 = arith.constant 0.000000e+00 : f32
    %4 = vector.broadcast %cst_2 : f32 to vector<8x384xf32>
    %cst_3 = arith.constant 0.000000e+00 : f32
    %5 = vector.broadcast %cst_3 : f32 to vector<1x384xf32>
    %cst_4 = arith.constant 0.000000e+00 : f32
    %6 = vector.broadcast %cst_4 : f32 to vector<1x384xf32>
    %7 = vector.extract_strided_slice %3 {offsets = [0, 0], sizes = [4, 384], strides = [1, 1]} : vector<4x512xf32> to vector<4x384xf32>
    %c0_5 = arith.constant 0 : index
    %c0_6 = arith.constant 0 : index
    %c0_7 = arith.constant 0 : index
    %8 = vector.load %arg2[%c0_5, %c0_6, %c0_7] : memref<4x8x4xf32, #tpu.memory_space<vmem>>, vector<1x8x4xf32>
    %9 = vector.shape_cast %8 : vector<1x8x4xf32> to vector<8x4xf32>
    %cst_8 = arith.constant dense<0.000000e+00> : vector<8x384xf32>
    %10 = tpu.matmul %9, %7, %cst_8 {dimension_numbers = #tpu.dot_dimension_numbers<[1], [0], [0], [1], [0, 0, 1, 1], [], []>} : vector<8x4xf32>, vector<4x384xf32>, vector<8x384xf32> -> vector<8x384xf32>
    %11 = arith.addf %4, %10 : vector<8x384xf32>
    %cst_9 = arith.constant dense<0.000000e+00> : vector<384xf32>
    %12 = vector.multi_reduction <add>, %7, %cst_9 [0] : vector<4x384xf32> to vector<384xf32>
    %13 = vector.shape_cast %12 : vector<384xf32> to vector<1x384xf32>
    %14 = arith.addf %5, %13 : vector<1x384xf32>
    %15 = arith.mulf %7, %7 : vector<4x384xf32>
    %cst_10 = arith.constant dense<0.000000e+00> : vector<384xf32>
    %16 = vector.multi_reduction <add>, %15, %cst_10 [0] : vector<4x384xf32> to vector<384xf32>
    %17 = vector.shape_cast %16 : vector<384xf32> to vector<1x384xf32>
    %18 = arith.addf %6, %17 : vector<1x384xf32>
    %19 = vector.extract_strided_slice %3 {offsets = [0, 1], sizes = [4, 384], strides = [1, 1]} : vector<4x512xf32> to vector<4x384xf32>
    %c1 = arith.constant 1 : index
    %c0_11 = arith.constant 0 : index
    %c0_12 = arith.constant 0 : index
    %20 = vector.load %arg2[%c1, %c0_11, %c0_12] : memref<4x8x4xf32, #tpu.memory_space<vmem>>, vector<1x8x4xf32>
    %21 = vector.shape_cast %20 : vector<1x8x4xf32> to vector<8x4xf32>
    %cst_13 = arith.constant dense<0.000000e+00> : vector<8x384xf32>
    %22 = tpu.matmul %21, %19, %cst_13 {dimension_numbers = #tpu.dot_dimension_numbers<[1], [0], [0], [1], [0, 0, 1, 1], [], []>} : vector<8x4xf32>, vector<4x384xf32>, vector<8x384xf32> -> vector<8x384xf32>
    %23 = arith.addf %11, %22 : vector<8x384xf32>
    %cst_14 = arith.constant dense<0.000000e+00> : vector<384xf32>
    %24 = vector.multi_reduction <add>, %19, %cst_14 [0] : vector<4x384xf32> to vector<384xf32>
    %25 = vector.shape_cast %24 : vector<384xf32> to vector<1x384xf32>
    %26 = arith.addf %14, %25 : vector<1x384xf32>
    %27 = arith.mulf %19, %19 : vector<4x384xf32>
    %cst_15 = arith.constant dense<0.000000e+00> : vector<384xf32>
    %28 = vector.multi_reduction <add>, %27, %cst_15 [0] : vector<4x384xf32> to vector<384xf32>
    %29 = vector.shape_cast %28 : vector<384xf32> to vector<1x384xf32>
    %30 = arith.addf %18, %29 : vector<1x384xf32>
    %31 = vector.extract_strided_slice %3 {offsets = [0, 18], sizes = [4, 384], strides = [1, 1]} : vector<4x512xf32> to vector<4x384xf32>
    %c2 = arith.constant 2 : index
    %c0_16 = arith.constant 0 : index
    %c0_17 = arith.constant 0 : index
    %32 = vector.load %arg2[%c2, %c0_16, %c0_17] : memref<4x8x4xf32, #tpu.memory_space<vmem>>, vector<1x8x4xf32>
    %33 = vector.shape_cast %32 : vector<1x8x4xf32> to vector<8x4xf32>
    %cst_18 = arith.constant dense<0.000000e+00> : vector<8x384xf32>
    %34 = tpu.matmul %33, %31, %cst_18 {dimension_numbers = #tpu.dot_dimension_numbers<[1], [0], [0], [1], [0, 0, 1, 1], [], []>} : vector<8x4xf32>, vector<4x384xf32>, vector<8x384xf32> -> vector<8x384xf32>
    %35 = arith.addf %23, %34 : vector<8x384xf32>
    %cst_19 = arith.constant dense<0.000000e+00> : vector<384xf32>
    %36 = vector.multi_reduction <add>, %31, %cst_19 [0] : vector<4x384xf32> to vector<384xf32>
    %37 = vector.shape_cast %36 : vector<384xf32> to vector<1x384xf32>
    %38 = arith.addf %26, %37 : vector<1x384xf32>
    %39 = arith.mulf %31, %31 : vector<4x384xf32>
    %cst_20 = arith.constant dense<0.000000e+00> : vector<384xf32>
    %40 = vector.multi_reduction <add>, %39, %cst_20 [0] : vector<4x384xf32> to vector<384xf32>
    %41 = vector.shape_cast %40 : vector<384xf32> to vector<1x384xf32>
    %42 = arith.addf %30, %41 : vector<1x384xf32>
    %43 = vector.extract_strided_slice %3 {offsets = [0, 19], sizes = [4, 384], strides = [1, 1]} : vector<4x512xf32> to vector<4x384xf32>
    %c3 = arith.constant 3 : index
    %c0_21 = arith.constant 0 : index
    %c0_22 = arith.constant 0 : index
    %44 = vector.load %arg2[%c3, %c0_21, %c0_22] : memref<4x8x4xf32, #tpu.memory_space<vmem>>, vector<1x8x4xf32>
    %45 = vector.shape_cast %44 : vector<1x8x4xf32> to vector<8x4xf32>
    %cst_23 = arith.constant dense<0.000000e+00> : vector<8x384xf32>
    %46 = tpu.matmul %45, %43, %cst_23 {dimension_numbers = #tpu.dot_dimension_numbers<[1], [0], [0], [1], [0, 0, 1, 1], [], []>} : vector<8x4xf32>, vector<4x384xf32>, vector<8x384xf32> -> vector<8x384xf32>
    %47 = arith.addf %35, %46 : vector<8x384xf32>
    %cst_24 = arith.constant dense<0.000000e+00> : vector<384xf32>
    %48 = vector.multi_reduction <add>, %43, %cst_24 [0] : vector<4x384xf32> to vector<384xf32>
    %49 = vector.shape_cast %48 : vector<384xf32> to vector<1x384xf32>
    %50 = arith.addf %38, %49 : vector<1x384xf32>
    %51 = arith.mulf %43, %43 : vector<4x384xf32>
    %cst_25 = arith.constant dense<0.000000e+00> : vector<384xf32>
    %52 = vector.multi_reduction <add>, %51, %cst_25 [0] : vector<4x384xf32> to vector<384xf32>
    %53 = vector.shape_cast %52 : vector<384xf32> to vector<1x384xf32>
    %54 = arith.addf %42, %53 : vector<1x384xf32>
    %cst_26 = arith.constant 6.250000e-02 : f32
    %55 = vector.broadcast %cst_26 : f32 to vector<1x384xf32>
    %56 = arith.mulf %50, %55 : vector<1x384xf32>
    %cst_27 = arith.constant 6.250000e-02 : f32
    %57 = vector.broadcast %cst_27 : f32 to vector<1x384xf32>
    %58 = arith.mulf %54, %57 : vector<1x384xf32>
    %59 = arith.mulf %56, %56 : vector<1x384xf32>
    %60 = arith.subf %58, %59 : vector<1x384xf32>
    %cst_28 = arith.constant 0.000000e+00 : f32
    %61 = vector.broadcast %cst_28 : f32 to vector<1x384xf32>
    %62 = arith.maximumf %60, %61 : vector<1x384xf32>
    %cst_29 = arith.constant 9.99999974E-6 : f32
    %63 = vector.broadcast %cst_29 : f32 to vector<1x384xf32>
    %64 = arith.addf %62, %63 : vector<1x384xf32>
    %65 = math.rsqrt %64 : vector<1x384xf32>
    %c0_30 = arith.constant 0 : index
    %c0_31 = arith.constant 0 : index
    %66 = vector.load %arg3[%c0_30, %c0_31] : memref<8x1xf32, #tpu.memory_space<vmem>>, vector<8x1xf32>
    %67 = vector.broadcast %66 : vector<8x1xf32> to vector<8x384xf32>
    %68 = vector.broadcast %56 : vector<1x384xf32> to vector<8x384xf32>
    %69 = arith.mulf %67, %68 : vector<8x384xf32>
    %70 = arith.subf %47, %69 : vector<8x384xf32>
    %71 = vector.broadcast %65 : vector<1x384xf32> to vector<8x384xf32>
    %72 = arith.mulf %70, %71 : vector<8x384xf32>
    %c0_32 = arith.constant 0 : index
    %c0_33 = arith.constant 0 : index
    %73 = vector.load %arg4[%c0_32, %c0_33] : memref<8x1xf32, #tpu.memory_space<vmem>>, vector<8x1xf32>
    %74 = vector.broadcast %73 : vector<8x1xf32> to vector<8x384xf32>
    %75 = arith.addf %72, %74 : vector<8x384xf32>
    %c0_34 = arith.constant 0 : index
    %c0_35 = arith.constant 0 : index
    %c0_36 = arith.constant 0 : index
    %76 = vector.load %arg5[%c0_34, %c0_35, %c0_36] : memref<1x8x384xf32, #tpu.memory_space<vmem>>, vector<1x8x384xf32>
    %77 = vector.shape_cast %76 : vector<1x8x384xf32> to vector<8x384xf32>
    %78 = vector.shape_cast %75 : vector<8x384xf32> to vector<1x8x384xf32>
    tpu.vector_store %arg5[%c0_34, %c0_35, %c0_36], %78 {strides = array<i32>} : memref<1x8x384xf32, #tpu.memory_space<vmem>>, vector<1x8x384xf32>,
    return
  }
  func.func @transform_0(%arg0: i32) -> (i32, i32, i32) {
    %c0_i32 = arith.constant 0 : i32
    %c0_i32_0 = arith.constant 0 : i32
    %c0_i32_1 = arith.constant 0 : i32
    return %arg0, %c0_i32, %c0_i32_0 : i32, i32, i32
  }
  func.func @transform_1(%arg0: i32) -> (i32, i32, i32) {
    %c0_i32 = arith.constant 0 : i32
    %c0_i32_0 = arith.constant 0 : i32
    %c0_i32_1 = arith.constant 0 : i32
    %c0_i32_2 = arith.constant 0 : i32
    return %c0_i32, %c0_i32_0, %c0_i32_1 : i32, i32, i32
  }
  func.func @transform_2(%arg0: i32) -> (i32, i32) {
    %c0_i32 = arith.constant 0 : i32
    %c0_i32_0 = arith.constant 0 : i32
    %c0_i32_1 = arith.constant 0 : i32
    return %c0_i32, %c0_i32_0 : i32, i32
  }
  func.func @transform_3(%arg0: i32) -> (i32, i32) {
    %c0_i32 = arith.constant 0 : i32
    %c0_i32_0 = arith.constant 0 : i32
    %c0_i32_1 = arith.constant 0 : i32
    return %c0_i32, %c0_i32_0 : i32, i32
  }
  func.func @transform_4(%arg0: i32) -> (i32, i32, i32) {
    %c0_i32 = arith.constant 0 : i32
    %c0_i32_0 = arith.constant 0 : i32
    %c0_i32_1 = arith.constant 0 : i32
    return %arg0, %c0_i32, %c0_i32_0 : i32, i32, i32
  }
}

</mosaic_0001>

<bundles_post_ra>
// kernel: conv_block_kn.1
= control target key start
LH: loop header
LB: loop body
LE: loop exit
PB: predicated region body
PF: predicated region fallthrough
CT: control target
= control target key end

     0   :  { %s1226_s15 = smov 0   ;;  %s1553_s0 = inlined_call_operand.vmem [shape: f32[2,4,512], index: 0, kind: input, shape index: {}]   ;;  %s1554_s1 = inlined_call_operand.vmem [shape: f32[4,8,4], index: 1, kind: input, shape index: {}]   ;;  %s1555_s2 = inlined_call_operand.vmem [shape: f32[8,1], index: 2, kind: input, shape index: {}]   ;;  %s1556_s3 = inlined_call_operand.vmem [shape: f32[8,1], index: 3, kind: input, shape index: {}]   ;;  %s1557_s4 = inlined_call_operand.vmem [shape: f32[2,8,384], index: 4, kind: output, shape index: {}]  }
   0x1 LB: > { %s1130_s16 = sadd.s32 4294967295, %s1195_s15   ;;  %p1134_p0 = scmp.ge.s32.totalorder %s1195_s15, 1  ;;  %s1195_s15 = sphi %s1226_s15, %s14_s15  }
   0x2   : > { %p162_p1 = scmp.lt.s32.totalorder %s1195_s15, 3 }
   0x4   : > { %p163_p2 = pnand %p1134_p0, %p162_p1 }
   0x5   : > { %p188_p3 = scmp.lt.s32.totalorder (!%p163_p2), %s1130_s16, 1  ;;  %s1197_s21 = smov (!%p163_p2), 127  }
   0x6   : > { %166 = sbr.rel (%p163_p2) target bundleno = 361 (0x169), region = 36  ;;  %s1198_s22 = smov (!%p163_p2), 110  }
   0x7   : > { %s1199_s23 = smov (!%p163_p2), 109  }
   0xb   : > { %s1561_s16 = smov (!%p188_p3, %s1130_s16), 1  ;;  %vm214_vm0 = vcmask 1043456   ;;  %vm453_vm1 = vcmask 1043464   ;;  %vm475_vm2 = vcmask 3072   ;;  %vm668_vm3 = vcmask 1043600  }
   0xc   : > { %s1167_s17 = sshll.u32 %s1561_s16, 4  ;;  %vm690_vm4 = vcmask 142336   ;;  %vm883_vm5 = vcmask 1043608   ;;  %vm905_vm6 = vcmask 150528   ;;  %vm297_vm7 = vcmask 31744   ;;  %s1168_s10 = smul.u32 24, %s1561_s16 }
   0xd   : > { %s192_s20 = scalar_lea.vmem %s1553_s0, %s1167_s17  ;;  %vm293_vm8 = vcmask 1039360   ;;  %vm581_vm9 = vcmask 900096   ;;  %vm796_vm10 = vcmask 891904  }
   0xe   : > { %v199_v0 = vld [vmem:[%s192_s20 + $0x8] sm:$0xff]  ;;  %v198_v1 = vld [vmem:[%s192_s20] sm:$0xff]  ;;  %s197_s13 = scalar_lea.vmem %s1557_s4, %s1168_s10 }
   0xf   : > { %v1240_v2 = vmax.f32 %v199_v0, 0.0  ;;  %v1242_v3 = vmax.f32 %v198_v1, 0.0 }
  0x11   : > { %207 = vst [vmem:[#allocation1 + $0x10] ss:$2 sm:$0xff] %v1240_v2  ;;  %v1248_v4 = vmul.f32 %v1240_v2, %v1240_v2  ;;  %v1252_v5 = vmul.f32 %v1242_v3, %v1242_v3 }
  0x12   : > { %205 = vst [vmem:[#allocation1] ss:$2 sm:$0xff] %v1242_v3 }
  0x18   : > { %v1254_v6 = vld.sshfl [vmem:[#allocation1 + $0x10] sm:$0xff pattern:$0x75316420] }
  0x19   : > { %245 = vst [vmem:[#allocation1 + $0x10] ss:$2 sm:$0xff] %v1248_v4  ;;  %v1257_v7 = vld.sshfl [vmem:[#allocation1] sm:$0xff pattern:$0x75316420] }
  0x1a   : > { %v1259_v8 = vld.sshfl [vmem:[#allocation1 + $0x8] sm:$0xff pattern:$0x75316420] }
  0x1b   : > { %243 = vst [vmem:[#allocation1] ss:$2 sm:$0xff] %v1252_v5 }
  0x20   : > { %v1262_v9 = vld.sshfl [vmem:[#allocation1 + $0x10] sm:$0xff pattern:$0x75316420] }
  0x21   : > { %280 = vst [vmem:[#allocation1 + $0x10] ss:$2 sm:$0xff] %v1240_v2 }
  0x22   : > { %v1265_v10 = vld.sshfl [vmem:[#allocation1] sm:$0xff pattern:$0x75316420]  ;;  %v1267_v11 = vld.sshfl [vmem:[#allocation1 + $0x8] sm:$0xff pattern:$0x75316420] }
  0x23   : > { %278 = vst [vmem:[#allocation1] ss:$2 sm:$0xff] %v1242_v3 }
  0x28   : > { %v283_v12 = vld.sshfl [vmem:[#allocation1 + $0x10] sm:$0xff pattern:$0x75316420]  ;;  %v284_v13 = vld.sshfl [vmem:[#allocation1 + $0x18] sm:$0xff pattern:$0x75316420] }
  0x29   : > { %289 = vrot.lane.b32.xlu0 %v283_v12, %s1197_s21  ;;  %369 = vst [vmem:[#allocation1 + $0x10] ss:$2 sm:$0xff] %v1240_v2 }
  0x2a   : > { %v281_v14 = vld.sshfl [vmem:[#allocation1] sm:$0xff pattern:$0x75316420]  ;;  %v282_v15 = vld.sshfl [vmem:[#allocation1 + $0x8] sm:$0xff pattern:$0x75316420] }
  0x2b   : > { %285 = vrot.lane.b32.xlu1 %v281_v14, %s1197_s21  ;;  %367 = vst [vmem:[#allocation1] ss:$2 sm:$0xff] %v1242_v3 }
  0x30   : > { %v1274_v16 = vld.sshfl [vmem:[#allocation1 + $0x10] sm:$0xff pattern:$0x75316420] }
  0x31   : > { %291 = vrot.lane.b32.xlu0 %v284_v13, %s1197_s21  ;;  %444 = vst [vmem:[#allocation1 + $0x10] ss:$2 sm:$0xff] %v1240_v2 }
  0x32   : > { %v370_v17 = vld.sshfl [vmem:[#allocation1] sm:$0xff pattern:$0x75316420]  ;;  %v1278_v18 = vld.sshfl [vmem:[#allocation1 + $0x8] sm:$0xff pattern:$0x75316420] }
  0x33   : > { %287 = vrot.lane.b32.xlu1 %v282_v15, %s1197_s21  ;;  %442 = vst [vmem:[#allocation1] ss:$2 sm:$0xff] %v1242_v3  ;;  %1145 = vmatpush.msk.msra.mxu3 %vm214_vm0, %v370_v17 }
  0x38   : > { %v447_v19 = vld.sshfl [vmem:[#allocation1 + $0x10] sm:$0xff pattern:$0x75316420]  ;;  %v448_v20 = vld.sshfl [vmem:[#allocation1 + $0x18] sm:$0xff pattern:$0x75316420] }
  0x39   : > { %506 = vst [vmem:[#allocation1 + $0x10] ss:$2 sm:$0xff] %v1248_v4  ;;  %v476_v37 = vsel %vm475_vm2, %v448_v20, 0.0  ;;  %v468_v51 = vsel %vm214_vm0, %v447_v19, 0.0 }
  0x3a   : > { %v445_v21 = vld.sshfl [vmem:[#allocation1] sm:$0xff pattern:$0x75316420]  ;;  %v446_v22 = vld.sshfl [vmem:[#allocation1 + $0x8] sm:$0xff pattern:$0x75316420] }
  0x3b   : > { %504 = vst [vmem:[#allocation1] ss:$2 sm:$0xff] %v1252_v5  ;;  %v454_v31 = vsel %vm453_vm1, %v445_v21, 0.0  ;;  %v461_v39 = vsel %vm214_vm0, %v446_v22, 0.0  ;;  %v477_v40 = vrot.slane %v476_v37, 4  ;;  %v469_v54 = vrot.slane %v468_v51, 4 }
  0x3c   : > { %v455_v34 = vrot.slane %v454_v31, 4  ;;  %v462_v44 = vrot.slane %v461_v39, 4 }
  0x3d   : > { %v478_v47 = vadd.f32 %v477_v40, %v476_v37  ;;  %v470_v60 = vadd.f32 %v469_v54, %v468_v51 }
  0x3e   : > { %v456_v38 = vadd.f32 %v455_v34, %v454_v31  ;;  %v463_v49 = vadd.f32 %v462_v44, %v461_v39 }
  0x3f   : > { %v479_v52 = vrot.slane %v478_v47, 2  ;;  %v471_v0 = vrot.slane %v470_v60, 2 }
  0x40   : > { %v509_v23 = vld.sshfl [vmem:[#allocation1 + $0x10] sm:$0xff pattern:$0x75316420]  ;;  %v1284_v24 = vld.sshfl [vmem:[#allocation1 + $0x18] sm:$0xff pattern:$0x75316420] }
  0x41   : > { %568 = vst [vmem:[#allocation1 + $0x10] ss:$2 sm:$0xff] %v1240_v2  ;;  %v457_v43 = vrot.slane %v456_v38, 2  ;;  %v529_v50 = vsel %vm214_vm0, %v509_v23, 0.0  ;;  %v464_v58 = vrot.slane %v463_v49, 2  ;;  %v480_v1 = vadd.f32 %v479_v52, %v478_v47 }
  0x42   : > { %v507_v25 = vld.sshfl [vmem:[#allocation1] sm:$0xff pattern:$0x75316420]  ;;  %v1287_v26 = vld.sshfl [vmem:[#allocation1 + $0x8] sm:$0xff pattern:$0x75316420]  ;;  %v472_v15 = vadd.f32 %v471_v0, %v470_v60 }
  0x43   : > { %566 = vst [vmem:[#allocation1] ss:$2 sm:$0xff] %v1242_v3  ;;  %v458_v48 = vadd.f32 %v457_v43, %v456_v38  ;;  %v515_v53 = vsel %vm453_vm1, %v507_v25, 0.0  ;;  %v530_v59 = vrot.slane %v529_v50, 4  ;;  %v465_v17 = vadd.f32 %v464_v58, %v463_v49 }
  0x44   : > { %v516_v63 = vrot.slane %v515_v53, 4  ;;  %v481_v21 = vrot.slane %v480_v1, 1  ;;  %v536_v22 = vsel %vm475_vm2, %v1284_v24, 0.0  ;;  %v473_v25 = vrot.slane %v472_v15, 1 }
  0x45   : > { %v459_v57 = vrot.slane %v458_v48, 1  ;;  %v531_v13 = vadd.f32 %v530_v59, %v529_v50 }
  0x46   : > { %v517_v19 = vadd.f32 %v516_v63, %v515_v53  ;;  %v482_v24 = vadd.f32 %v481_v21, %v480_v1  ;;  %v474_v38 = vadd.f32 %v473_v25, %v472_v15 }
  0x47   : > { %v460_v12 = vadd.f32 %v459_v57, %v458_v48 }
  0x48   : > { %v571_v27 = vld.sshfl [vmem:[#allocation1 + $0x10] sm:$0xff pattern:$0x75316420]  ;;  %v1291_v28 = vld.sshfl [vmem:[#allocation1 + $0x18] sm:$0xff pattern:$0x75316420] }
  0x49   : > { %577 = vrot.lane.b32.xlu0 %v571_v27, %s1198_s22  ;;  %659 = vst [vmem:[#allocation1 + $0x10] ss:$2 sm:$0xff] %v1240_v2 }
  0x4a   : > { %v569_v29 = vld.sshfl [vmem:[#allocation1] sm:$0xff pattern:$0x75316420]  ;;  %v570_v30 = vld.sshfl [vmem:[#allocation1 + $0x8] sm:$0xff pattern:$0x75316420] }
  0x4b   : > { %573 = vrot.lane.b32.xlu2 %v569_v29, %s1198_s22  ;;  %657 = vst [vmem:[#allocation1] ss:$2 sm:$0xff] %v1242_v3  ;;  %v466_v29 = vrot.slane %v465_v17, 1 }
  0x4d   : > { %v467_v44 = vadd.f32 %v466_v29, %v465_v17 }
  0x50   : > { %v1298_v32 = vld.sshfl [vmem:[#allocation1 + $0x10] sm:$0xff pattern:$0x75316420]  ;;  %v1300_v33 = vld.sshfl [vmem:[#allocation1 + $0x18] sm:$0xff pattern:$0x75316420] }
  0x51   : > { %721 = vst [vmem:[#allocation1 + $0x10] ss:$2 sm:$0xff] %v1248_v4  ;;  %v683_v49 = vsel %vm214_vm0, %v1298_v32, 0.0  ;;  %v691_v1 = vsel %vm690_vm4, %v1300_v33, 0.0 }
  0x52   : > { %v1303_v35 = vld.sshfl [vmem:[#allocation1] sm:$0xff pattern:$0x75316420]  ;;  %v661_v36 = vld.sshfl [vmem:[#allocation1 + $0x8] sm:$0xff pattern:$0x75316420] }
  0x53   : > { %719 = vst [vmem:[#allocation1] ss:$2 sm:$0xff] %v1252_v5  ;;  %575 = vrot.lane.b32.xlu2 %v570_v30, %s1198_s22  ;;  %v676_v14 = vsel %vm214_vm0, %v661_v36, 0.0  ;;  %v537_v30 = vrot.slane %v536_v22, 4  ;;  %v669_v47 = vsel %vm668_vm3, %v1303_v35, 0.0  ;;  %v692_v15 = vrot.slane %v691_v1, 4 }
  0x54   : > { %v677_v23 = vrot.slane %v676_v14, 4  ;;  %v670_v50 = vrot.slane %v669_v47, 4 }
  0x55   : > { %v538_v48 = vadd.f32 %v537_v30, %v536_v22 }
  0x56   : > { %v678_v34 = vadd.f32 %v677_v23, %v676_v14  ;;  %v671_v54 = vadd.f32 %v670_v50, %v669_v47 }
  0x57   : > { %v539_v35 = vrot.slane %v538_v48, 2 }
  0x58   : > { %v1309_v41 = vld.sshfl [vmem:[#allocation1 + $0x10] sm:$0xff pattern:$0x75316420]  ;;  %v1311_v42 = vld.sshfl [vmem:[#allocation1 + $0x18] sm:$0xff pattern:$0x75316420] }
  0x59   : > { %783 = vst [vmem:[#allocation1 + $0x10] ss:$2 sm:$0xff] %v1240_v2  ;;  %v751_v32 = vsel %vm690_vm4, %v1311_v42, 0.0 }
  0x5a   : > { %v722_v45 = vld.sshfl [vmem:[#allocation1] sm:$0xff pattern:$0x75316420]  ;;  %v1314_v46 = vld.sshfl [vmem:[#allocation1 + $0x8] sm:$0xff pattern:$0x75316420] }
  0x5b   : > { %781 = vst [vmem:[#allocation1] ss:$2 sm:$0xff] %v1242_v3  ;;  %v730_v36 = vsel %vm668_vm3, %v722_v45, 0.0  ;;  %v679_v45 = vrot.slane %v678_v34, 2  ;;  %v737_v14 = vsel %vm214_vm0, %v1314_v46, 0.0 }
  0x5c   : > { %v731_v51 = vrot.slane %v730_v36, 4  ;;  %v738_v22 = vrot.slane %v737_v14, 4 }
  0x5d   : > { %v680_v57 = vadd.f32 %v679_v45, %v678_v34 }
  0x5e   : > { %v732_v58 = vadd.f32 %v731_v51, %v730_v36  ;;  %v739_v30 = vadd.f32 %v738_v22, %v737_v14 }
  0x5f   : > { %v681_v17 = vrot.slane %v680_v57, 1 }
  0x60   : > { %v787_v55 = vld.sshfl [vmem:[#allocation1 + $0x18] sm:$0xff pattern:$0x75316420]  ;;  %v786_v56 = vld.sshfl [vmem:[#allocation1 + $0x10] sm:$0xff pattern:$0x75316420] }
  0x61   : > { %794 = vrot.lane.b32.xlu0 %v787_v55, %s1199_s23  ;;  %792 = vrot.lane.b32.xlu2 %v786_v56, %s1199_s23  ;;  %874 = vst [vmem:[#allocation1 + $0x10] ss:$2 sm:$0xff] %v1240_v2  ;;  %v522_v2 = vsel %vm214_vm0, %v1287_v26, 0.0  ;;  %v518_v26 = vrot.slane %v517_v19, 2  ;;  %v684_v55 = vrot.slane %v683_v49, 4  ;;  %v672_v56 = vrot.slane %v671_v54, 2 }
  0x62   : > { %v785_v61 = vld.sshfl [vmem:[#allocation1 + $0x8] sm:$0xff pattern:$0x75316420]  ;;  %v784_v62 = vld.sshfl [vmem:[#allocation1] sm:$0xff pattern:$0x75316420]  ;;  %v682_v23 = vadd.f32 %v681_v17, %v680_v57 }
  0x63   : > { %790 = vrot.lane.b32.xlu1 %v785_v61, %s1199_s23  ;;  %872 = vst [vmem:[#allocation1] ss:$2 sm:$0xff] %v1242_v3  ;;  %v523_v20 = vrot.slane %v522_v2, 4  ;;  %v532_v3 = vrot.slane %v531_v13, 2  ;;  %v673_v61 = vadd.f32 %v672_v56, %v671_v54  ;;  %v685_v0 = vadd.f32 %v684_v55, %v683_v49 }
  0x64   : > { %v733_v42 = vrot.slane %v732_v58, 2 }
  0x65   : > { %v524_v27 = vadd.f32 %v523_v20, %v522_v2  ;;  %v533_v37 = vadd.f32 %v532_v3, %v531_v13  ;;  %v540_v13 = vadd.f32 %v539_v35, %v538_v48  ;;  %v752_v2 = vrot.slane %v751_v32, 4 }
  0x66   : > { %v693_v20 = vadd.f32 %v692_v15, %v691_v1  ;;  %v686_v21 = vrot.slane %v685_v0, 2  ;;  %v734_v3 = vadd.f32 %v733_v42, %v732_v58  ;;  %v740_v48 = vrot.slane %v739_v30, 2 }
  0x67   : > { %v525_v31 = vrot.slane %v524_v27, 2  ;;  %v534_v52 = vrot.slane %v533_v37, 1  ;;  %v753_v25 = vadd.f32 %v752_v2, %v751_v32 }
  0x68   : > { %v1347_v63 = vld.sshfl [vmem:[#allocation1 + $0x18] sm:$0xff pattern:$0x75316420]  ;;  %v694_v33 = vrot.slane %v693_v20, 2  ;;  %v741_v55 = vadd.f32 %v740_v48, %v739_v30 }
  0x69   : > { %487 = vrot.lane.b32.xlu0 %v460_v12, %s1197_s21  ;;  %788 = vrot.lane.b32.xlu2 %v784_v62, %s1199_s23  ;;  %v526_v39 = vadd.f32 %v525_v31, %v524_v27  ;;  %v535_v59 = vadd.f32 %v534_v52, %v533_v37  ;;  %v877_v62 = vld.sshfl [vmem:[#allocation1 + $0x10] sm:$0xff pattern:$0x75316420]  ;;  %v744_v31 = vsel %vm214_vm0, %v1309_v41, 0.0  ;;  %v1200_v52 = vmov 0  }
  0x6a   : > { %v875_v40 = vld.sshfl [vmem:[#allocation1] sm:$0xff pattern:$0x75316420]  ;;  %v1335_v43 = vld.sshfl [vmem:[#allocation1 + $0x8] sm:$0xff pattern:$0x75316420]  ;;  %v695_v29 = vadd.f32 %v694_v33, %v693_v20  ;;  %1181 = vset.pattern.permute.xlu0 %v1200_v52  ;;  %1182 = vset.pattern.permute.xlu1 %v1200_v52 }
  0x6b   : > { %579 = vrot.lane.b32.xlu1 %v1291_v28, %s1198_s22  ;;  %934 = vst [vmem:[#allocation1] ss:$2 sm:$0xff] %v1252_v5  ;;  %v519_v28 = vadd.f32 %v518_v26, %v517_v19  ;;  %v527_v53 = vrot.slane %v526_v39, 1  ;;  %v674_v19 = vrot.slane %v673_v61, 1  ;;  %v898_v27 = vsel %vm214_vm0, %v877_v62, 0.0 }
  0x6c   : > { %936 = vst [vmem:[#allocation1 + $0x10] ss:$2 sm:$0xff] %v1248_v4  ;;  %v541_v4 = vrot.slane %v540_v13, 1  ;;  %v687_v26 = vadd.f32 %v686_v21, %v685_v0  ;;  %v745_v36 = vrot.slane %v744_v31, 4  ;;  %v884_v37 = vsel %vm883_vm5, %v875_v40, 0.0 }
  0x6d   : > { %v520_v5 = vrot.slane %v519_v28, 1  ;;  %v528_v60 = vadd.f32 %v527_v53, %v526_v39  ;;  %v675_v46 = vadd.f32 %v674_v19, %v673_v61  ;;  %v735_v39 = vrot.slane %v734_v3, 1 }
  0x6e   : > { %v542_v34 = vadd.f32 %v541_v4, %v540_v13  ;;  %v746_v47 = vadd.f32 %v745_v36, %v744_v31  ;;  %v885_v49 = vrot.slane %v884_v37, 4  ;;  %v891_v35 = vsel %vm214_vm0, %v1335_v43, 0.0 }
  0x6f   : > { %v521_v12 = vadd.f32 %v520_v5, %v519_v28  ;;  %v688_v28 = vrot.slane %v687_v26, 1  ;;  %v736_v40 = vadd.f32 %v735_v39, %v734_v3  ;;  %v892_v58 = vrot.slane %v891_v35, 4 }
  0x70   : > { %v747_v41 = vrot.slane %v746_v47, 2  ;;  %v886_v57 = vadd.f32 %v885_v49, %v884_v37  ;;  %v742_v1 = vrot.slane %v741_v55, 1 }
  0x71   : > { %493 = vrot.lane.b32.xlu0 %v482_v24, %s1197_s21  ;;  %491 = vrot.lane.b32.xlu2 %v474_v38, %s1197_s21  ;;  %v754_v24 = vrot.slane %v753_v25, 2  ;;  %v899_v38 = vrot.slane %v898_v27, 4  ;;  %v689_v56 = vadd.f32 %v688_v28, %v687_v26  ;;  %v893_v0 = vadd.f32 %v892_v58, %v891_v35 }
  0x72   : > { %v938_v50 = vld.sshfl [vmem:[#allocation1 + $0x8] sm:$0xff pattern:$0x75316420]  ;;  %v748_v54 = vadd.f32 %v747_v41, %v746_v47  ;;  %v937_v14 = vld.sshfl [vmem:[#allocation1] sm:$0xff pattern:$0x75316420]  ;;  %v743_v4 = vadd.f32 %v742_v1, %v741_v55 }
  0x73   : > { %489 = vrot.lane.b32.xlu1 %v467_v44, %s1197_s21  ;;  %v696_v44 = vrot.slane %v695_v29, 1  ;;  %v755_v45 = vadd.f32 %v754_v24, %v753_v25  ;;  %v900_v51 = vadd.f32 %v899_v38, %v898_v27  ;;  %v952_v5 = vsel %vm214_vm0, %v938_v50, 0.0  ;;  %v940_v2 = vld.sshfl [vmem:[#allocation1 + $0x18] sm:$0xff pattern:$0x75316420] }
  0x74   : > { %v953_v61 = vrot.slane %v952_v5, 4  ;;  %v749_v62 = vrot.slane %v748_v54, 1  ;;  %v894_v13 = vrot.slane %v893_v0, 2  ;;  %v945_v42 = vsel %vm883_vm5, %v937_v14, 0.0 }
  0x75   : > { %v697_v53 = vadd.f32 %v696_v44, %v695_v29  ;;  %v756_v32 = vrot.slane %v755_v45, 1  ;;  %v939_v20 = vld.sshfl [vmem:[#allocation1 + $0x10] sm:$0xff pattern:$0x75316420]  ;;  %v946_v22 = vrot.slane %v945_v42, 4  ;;  %v966_v33 = vsel %vm905_vm6, %v940_v2, 0.0 }
  0x76   : > { %v750_v19 = vadd.f32 %v749_v62, %v748_v54  ;;  %v895_v21 = vadd.f32 %v894_v13, %v893_v0  ;;  %v959_v29 = vsel %vm214_vm0, %v939_v20, 0.0  ;;  %v1063_v2 = vld [vmem:[%s1556_s3] sm:$0xff] }
  0x77   : > { %v757_v15 = vadd.f32 %v756_v32, %v755_v45  ;;  %v947_v25 = vadd.f32 %v946_v22, %v945_v42  ;;  %v960_v37 = vrot.slane %v959_v29, 4 }
  0x78   : > { %v896_v30 = vrot.slane %v895_v21, 1 }
  0x79   : > { %551 = vrot.lane.b32.xlu0 %v535_v59, %s1197_s21  ;;  %549 = vrot.lane.b32.xlu2 %v528_v60, %s1197_s21  ;;  %v901_v59 = vrot.slane %v900_v51, 2  ;;  %v906_v60 = vsel %vm905_vm6, %v1347_v63, 0.0  ;;  %v954_v63 = vadd.f32 %v953_v61, %v952_v5  ;;  %v948_v31 = vrot.slane %v947_v25, 2 }
  0x7a   : > { %v907_v43 = vrot.slane %v906_v60, 4  ;;  %v897_v44 = vadd.f32 %v896_v30, %v895_v21  ;;  %v961_v50 = vadd.f32 %v960_v37, %v959_v29 }
  0x7b   : > { %547 = vrot.lane.b32.xlu1 %v521_v12, %s1197_s21  ;;  %v887_v12 = vrot.slane %v886_v57, 2  ;;  %v902_v17 = vadd.f32 %v901_v59, %v900_v51  ;;  %v955_v26 = vrot.slane %v954_v63, 2  ;;  %v949_v47 = vadd.f32 %v948_v31, %v947_v25 }
  0x7c   : > { %v908_v3 = vadd.f32 %v907_v43, %v906_v60  ;;  %v1138_v60 = vld [vmem:[%s1554_s1 + $0x8] sm:$0xff] }
  0x7d   : > { %v903_v27 = vrot.slane %v902_v17, 1  ;;  %v956_v39 = vadd.f32 %v955_v26, %v954_v63  ;;  %v950_v45 = vrot.slane %v949_v47, 1 }
  0x7e   : > { %v909_v24 = vrot.slane %v908_v3, 2 }
  0x7f   : > { %v904_v38 = vadd.f32 %v903_v27, %v902_v17  ;;  %v957_v41 = vrot.slane %v956_v39, 1  ;;  %v951_v5 = vadd.f32 %v950_v45, %v949_v47  ;;  %v1151_v17 = vld [vmem:[%s1554_s1 + $0x10] sm:$0xff] }
  0x80   : > { %v910_v49 = vadd.f32 %v909_v24, %v908_v3 }
  0x81   : > { %704 = vrot.lane.b32.xlu0 %v682_v23, %s1198_s22  ;;  %702 = vrot.lane.b32.xlu2 %v675_v46, %s1198_s22  ;;  %v888_v23 = vadd.f32 %v887_v12, %v886_v57  ;;  %v1377_v46 = vld [vmem:[%s1554_s1] sm:$0xff]  ;;  %v958_v54 = vadd.f32 %v957_v41, %v956_v39  ;;  %v215_v39 = vsel %vm214_vm0, %v1257_v7, 0.0 }
  0x82   : > { %1146 = vmatmul.msk.f32.vlgmr.msra.gmra.mxu3 %vm297_vm7, %v1377_v46  ;;  %v911_v52 = vrot.slane %v910_v49, 1  ;;  %v1042_v12 = vld [vmem:[%s1555_s2] sm:$0xff] }
  0x83   : > { %553 = vrot.lane.b32.xlu1 %v542_v34, %s1197_s21  ;;  %v967_v34 = vrot.slane %v966_v33, 4  ;;  %v889_v36 = vrot.slane %v888_v23, 1 }
  0x85   : > { %v968_v28 = vadd.f32 %v967_v34, %v966_v33  ;;  %v890_v48 = vadd.f32 %v889_v36, %v888_v23 }
  0x87   : > { %v969_v51 = vrot.slane %v968_v28, 2 }
  0x89   : > { %762 = vrot.lane.b32.xlu0 %v736_v40, %s1198_s22  ;;  %708 = vrot.lane.b32.xlu2 %v697_v53, %s1198_s22  ;;  %v962_v40 = vrot.slane %v961_v50, 2  ;;  %v970_v35 = vadd.f32 %v969_v51, %v968_v28  ;;  %v252_v28 = vsel %vm214_vm0, %v1265_v10, 0.0  ;;  %v229_v10 = vsel %vm214_vm0, %v1254_v6, 0.0 }
  0x8b   : > { %706 = vrot.lane.b32.xlu1 %v689_v56, %s1198_s22  ;;  %v912_v56 = vadd.f32 %v911_v52, %v910_v49  ;;  %v963_v57 = vadd.f32 %v962_v40, %v961_v50  ;;  %v971_v58 = vrot.slane %v970_v35, 1  ;;  %v253_v49 = vrot.slane %v252_v28, 4 }
  0x8c   : > { %v222_v50 = vsel %vm214_vm0, %v1259_v8, 0.0  ;;  %v259_v40 = vsel %vm214_vm0, %v1267_v11, 0.0 }
  0x8d   : > { %v964_v32 = vrot.slane %v963_v57, 1  ;;  %v972_v1 = vadd.f32 %v971_v58, %v970_v35  ;;  %v223_v51 = vrot.slane %v222_v50, 4  ;;  %v254_v52 = vadd.f32 %v253_v49, %v252_v28 }
  0x8e   : > { %v260_v35 = vrot.slane %v259_v40, 4 }
  0x8f   : > { %v965_v14 = vadd.f32 %v964_v32, %v963_v57  ;;  %v224_v8 = vadd.f32 %v223_v51, %v222_v50  ;;  %v230_v57 = vrot.slane %v229_v10, 4 }
  0x90   : > { %v261_v11 = vadd.f32 %v260_v35, %v259_v40 }
  0x91   : > { %768 = vrot.lane.b32.xlu0 %v757_v15, %s1198_s22  ;;  %766 = vrot.lane.b32.xlu2 %v750_v19, %s1198_s22  ;;  %v225_v32 = vrot.slane %v224_v8, 2 }
  0x93   : > { %764 = vrot.lane.b32.xlu1 %v743_v4, %s1198_s22  ;;  %v1158_v4 = vld [vmem:[%s1554_s1 + $0x18] sm:$0xff] }
  0x99   : > { %921 = vrot.lane.b32.xlu0 %v904_v38, %s1199_s23  ;;  %919 = vrot.lane.b32.xlu2 %v897_v44, %s1199_s23 }
  0x9b   : > { %917 = vrot.lane.b32.xlu1 %v890_v48, %s1199_s23  ;;  %v290_v53 = vpop.permute.xlu0 %289  ;;  %v216_v48 = vrot.slane %v215_v39, 4 }
  0x9d   : > { %v286_v55 = vpop.permute.xlu1 %285  ;;  %v217_v41 = vadd.f32 %v216_v48, %v215_v39 }
  0x9f   : > { %v218_v7 = vrot.slane %v217_v41, 2 }
  0xa1   : > { %979 = vrot.lane.b32.xlu0 %v958_v54, %s1199_s23  ;;  %977 = vrot.lane.b32.xlu2 %v951_v5, %s1199_s23  ;;  %v255_v5 = vrot.slane %v254_v52, 2 }
  0xa3   : > { %923 = vrot.lane.b32.xlu1 %v912_v56, %s1199_s23  ;;  %v292_v59 = vpop.permute.xlu0 %291  ;;  %v219_v56 = vadd.f32 %v218_v7, %v217_v41 }
  0xa4   : > { %v296_v61 = vsel %vm293_vm8, %v290_v53, %v292_v59  ;;  %v256_v59 = vadd.f32 %v255_v5, %v254_v52 }
  0xa5   : > { %v574_v62 = vpop.permute.xlu2 %573  ;;  %v288_v0 = vpop.permute.xlu1 %287  ;;  %1143 = vmatpush.msk.msra.mxu2 %vm214_vm0, %v296_v61  ;;  %v220_v61 = vrot.slane %v219_v56, 1 }
  0xa6   : > { %v295_v43 = vsel %vm293_vm8, %v288_v0, %v290_v53  ;;  %v294_v13 = vsel %vm293_vm8, %v286_v55, %v288_v0  ;;  %1144 = vmatmul.msk.f32.vlgmr.msra.gmra.mxu2 %vm297_vm7, %v1138_v60  ;;  %v266_v55 = vsel %vm214_vm0, %v1262_v9, 0.0 }
  0xa7   : > { %1141 = vmatpush.msk.msra.mxu1 %vm214_vm0, %v295_v43  ;;  %1139 = vmatpush.msk.msra.mxu0 %vm214_vm0, %v294_v13  ;;  %v267_v58 = vrot.slane %v266_v55, 4  ;;  %v262_v43 = vrot.slane %v261_v11, 2 }
  0xa8   : > { %1142 = vmatmul.msk.f32.vlgmr.msra.gmra.mxu1 %vm297_vm7, %v1138_v60  ;;  %1140 = vmatmul.msk.f32.vlgmr.msra.gmra.mxu0 %vm297_vm7, %v1138_v60 }
  0xa9   : > { %1045 = vperm.xlu0 %1181, %v1042_v12   ;;  %983 = vrot.lane.b32.xlu2 %v972_v1, %s1199_s23  ;;  %v268_v0 = vadd.f32 %v267_v58, %v266_v55  ;;  %v226_v1 = vadd.f32 %v225_v32, %v224_v8  ;;  %v257_v12 = vrot.slane %v256_v59, 1 }
  0xaa   : > { %1149 = vmatpush.msk.msrb.mxu1 %vm214_vm0, %v1274_v16  ;;  %1147 = vmatpush.msk.msrb.mxu0 %vm214_vm0, %v1278_v18 }
  0xab   : > { %981 = vrot.lane.b32.xlu1 %v965_v14, %s1199_s23  ;;  %v221_v14 = vadd.f32 %v220_v61, %v219_v56 }
  0xad   : > { %v576_v15 = vpop.permute.xlu2 %575 }
  0xae   : > { %v582_v42 = vsel %vm581_vm9, %v574_v62, %v576_v15  ;;  %v231_v62 = vadd.f32 %v230_v57, %v229_v10 }
  0xaf   : > { %1152 = vmatpush.msk.msrb.mxu2 %vm214_vm0, %v582_v42  ;;  %v227_v42 = vrot.slane %v226_v1, 1 }
  0xb0   : > { %1150 = vmatmul.msk.f32.vlgmr.msrb.gmra.mxu1 %vm297_vm7, %v1377_v46  ;;  %1153 = vmatmul.msk.f32.vlgmr.msrb.gmra.mxu2 %vm297_vm7, %v1151_v17  ;;  %v232_v9 = vrot.slane %v231_v62, 2 }
  0xb1   : > { %1148 = vmatmul.msk.f32.vlgmr.msrb.gmra.mxu0 %vm297_vm7, %v1377_v46 }
  0xb3   : > { %1066 = vperm.xlu1 %1182, %v1063_v2  }
  0xbb   : > { %v578_v16 = vpop.permute.xlu0 %577  ;;  %v793_v63 = vpop.permute.xlu2 %792 }
  0xbc   : > { %v583_v18 = vsel %vm581_vm9, %v576_v15, %v578_v16  ;;  %v269_v15 = vrot.slane %v268_v0, 2 }
  0xbd   : > { %1154 = vmatpush.msk.msrb.mxu3 %vm214_vm0, %v583_v18  ;;  %v263_v18 = vadd.f32 %v262_v43, %v261_v11 }
  0xbe   : > { %1155 = vmatmul.msk.f32.vlgmr.msrb.gmra.mxu3 %vm297_vm7, %v1151_v17 }
  0xc3   : > { %v789_v20 = vpop.permute.xlu2 %788 }
  0xcb   : > { %v1443_v27 = vpop.permute.xlu2 %491 }
  0xd3   : > { %v795_v19 = vpop.permute.xlu0 %794  ;;  %v1447_v30 = vpop.permute.xlu2 %549 }
  0xd4   : > { %v799_v21 = vsel %vm796_vm10, %v793_v63, %v795_v19  ;;  %v233_v19 = vadd.f32 %v232_v9, %v231_v62 }
  0xd5   : > { %v791_v22 = vpop.permute.xlu1 %790  ;;  %1163 = vmatpush.msk.msra.mxu3 %vm214_vm0, %v799_v21 }
  0xd6   : > { %v798_v33 = vsel %vm796_vm10, %v791_v22, %v793_v63  ;;  %v797_v23 = vsel %vm796_vm10, %v789_v20, %v791_v22  ;;  %1164 = vmatmul.msk.f32.vlgmr.msra.gmra.mxu3 %vm297_vm7, %v1158_v4  ;;  %v270_v20 = vadd.f32 %v269_v15, %v268_v0 }
  0xd7   : > { %1159 = vmatpush.msk.msra.mxu1 %vm214_vm0, %v797_v23  ;;  %1161 = vmatpush.msk.msra.mxu2 %vm214_vm0, %v798_v33  ;;  %v264_v23 = vrot.slane %v263_v18, 1 }
  0xd8   : > { %1160 = vmatmul.msk.f32.vlgmr.msra.gmra.mxu1 %vm297_vm7, %v1158_v4  ;;  %1162 = vmatmul.msk.f32.vlgmr.msra.gmra.mxu2 %vm297_vm7, %v1158_v4  ;;  %v228_v4 = vadd.f32 %v227_v42, %v226_v1  ;;  %v271_v39 = vrot.slane %v270_v20, 1 }
  0xd9   : > { %v265_v41 = vadd.f32 %v264_v23, %v263_v18 }
  0xda   : > { %v272_v40 = vadd.f32 %v271_v39, %v270_v20 }
  0xdb   : > { %v488_v3 = vpop.permute.xlu0 %487  ;;  %v703_v24 = vpop.permute.xlu2 %702 }
  0xdd   : > { %v580_v25 = vpop.permute.xlu1 %579 }
  0xde   : > { %v584_v46 = vsel %vm581_vm9, %v578_v16, %v580_v25  ;;  %v258_v16 = vadd.f32 %v257_v12, %v256_v59 }
  0xdf   : > { %1156 = vmatpush.msk.msra.mxu0 %vm214_vm0, %v584_v46  ;;  %v234_v46 = vrot.slane %v233_v19, 1 }
  0xe0   : > { %1157 = vmatmul.msk.f32.vlgmr.msra.gmra.mxu0 %vm297_vm7, %v1151_v17 }
  0xe1   : > { %v235_v52 = vadd.f32 %v234_v46, %v233_v19 }
  0xe3   : > { %v1445_v29 = vpop.permute.xlu0 %493  ;;  %v1459_v44 = vpop.permute.xlu2 %708 }
  0xe4   : > { %v497_v10 = vsel %vm293_vm8, %v1443_v27, %v1445_v29 }
  0xe5   : > { %v490_v26 = vpop.permute.xlu1 %489  ;;  %v503_v57 = vadd.f32 %v497_v10, %v235_v52 }
  0xe6   : > { %v495_v17 = vsel %vm293_vm8, %v488_v3, %v490_v26  ;;  %v496_v25 = vsel %vm293_vm8, %v490_v26, %v1443_v27 }
  0xe7   : > { %v501_v63 = vadd.f32 %v495_v17, %v221_v14  ;;  %v502_v50 = vadd.f32 %v496_v25, %v228_v4 }
  0xeb   : > { %v1449_v31 = vpop.permute.xlu0 %551  ;;  %v1469_v53 = vpop.permute.xlu2 %766 }
  0xed   : > { %v548_v34 = vpop.permute.xlu1 %547 }
  0xee   : > { %v555_v2 = vsel %vm293_vm8, %v548_v34, %v1447_v30 }
  0xef   : > { %v561_v33 = vadd.f32 %v555_v2, %v258_v16 }
  0xf3   : > { %v1453_v37 = vpop.permute.xlu0 %704  ;;  %v920_v6 = vpop.permute.xlu2 %919 }
  0xf4   : > { %v710_v22 = vsel %vm581_vm9, %v703_v24, %v1453_v37  ;;  %v556_v24 = vsel %vm293_vm8, %v1447_v30, %v1449_v31 }
  0xf5   : > { %v1451_v36 = vpop.permute.xlu1 %553  ;;  %v716_v28 = vadd.f32 %v710_v22, %v501_v63  ;;  %v562_v8 = vadd.f32 %v556_v24, %v265_v41 }
  0xf6   : > { %v557_v55 = vsel %vm293_vm8, %v1449_v31, %v1451_v36 }
  0xf7   : > { %v563_v58 = vadd.f32 %v557_v55, %v272_v40 }
  0xfb   : > { %v763_v47 = vpop.permute.xlu0 %762  ;;  %v978_v34 = vpop.permute.xlu2 %977 }
  0xfd   : > { %v1455_v38 = vpop.permute.xlu1 %706 }
  0xfe   : > { %v711_v26 = vsel %vm581_vm9, %v1453_v37, %v1455_v38  ;;  %v712_v27 = vsel %vm581_vm9, %v1455_v38, %v1459_v44 }
  0xff   : > { %v717_v5 = vadd.f32 %v711_v26, %v502_v50  ;;  %v718_v61 = vadd.f32 %v712_v27, %v503_v57 }
 0x103   : > { %v1471_v54 = vpop.permute.xlu0 %768 }
 0x104   : > { %v772_v29 = vsel %vm581_vm9, %v1469_v53, %v1471_v54 }
 0x105   : > { %v1465_v45 = vpop.permute.xlu1 %764  ;;  %v778_v62 = vadd.f32 %v772_v29, %v563_v58 }
 0x106   : > { %v770_v3 = vsel %vm581_vm9, %v763_v47, %v1465_v45  ;;  %v771_v37 = vsel %vm581_vm9, %v1465_v45, %v1469_v53  ;;  %v984_v45 = vpop.permute.xlu2 %983 }
 0x107   : > { %v776_v51 = vadd.f32 %v770_v3, %v561_v33  ;;  %v777_v36 = vadd.f32 %v771_v37, %v562_v8 }
 0x10b   : > { %v922_v13 = vpop.permute.xlu0 %921 }
 0x10c   : > { %v926_v56 = vsel %vm796_vm10, %v920_v6, %v922_v13 }
 0x10d   : > { %v918_v60 = vpop.permute.xlu1 %917  ;;  %v932_v59 = vadd.f32 %v926_v56, %v717_v5 }
 0x10e   : > { %v925_v49 = vsel %vm796_vm10, %v918_v60, %v920_v6 }
 0x10f   : > { %v931_v7 = vadd.f32 %v925_v49, %v716_v28  ;;  %v1517_v44 = vmul.f32 0.0625, %v932_v59  ;;  %v399_v49 = vpop.f32.mrf.mxu3 }
 0x111   : > { %v1504_v32 = vmul.f32 0.0625, %v931_v7  ;;  %v1001_v6 = vmul.f32 %v1517_v44, %v1517_v44  ;;  %v1049_v59 = vperm.slane %v1517_v44, 0 }
 0x113   : > { %v980_v48 = vpop.permute.xlu0 %979  ;;  %v1000_v0 = vmul.f32 %v1504_v32, %v1504_v32  ;;  %v1048_v55 = vperm.slane %v1504_v32, 0 }
 0x114   : > { %v985_v47 = vsel %vm796_vm10, %v978_v34, %v980_v48 }
 0x115   : > { %v924_v21 = vpop.permute.xlu1 %923  ;;  %v991_v30 = vadd.f32 %v985_v47, %v776_v51 }
 0x116   : > { %v927_v60 = vsel %vm796_vm10, %v922_v13, %v924_v21 }
 0x117   : > { %v997_v11 = vmul.f32 0.0625, %v991_v30  ;;  %v933_v12 = vadd.f32 %v927_v60, %v718_v61 }
 0x119   : > { %v1003_v53 = vsub.f32 %v997_v11, %v1000_v0  ;;  %v1521_v14 = vmul.f32 0.0625, %v933_v12 }
 0x11b   : > { %v1006_v13 = vmax.f32 %v1003_v53, 0.0  ;;  %v1002_v17 = vmul.f32 %v1521_v14, %v1521_v14  ;;  %v1046_v40 = vpop.permute.xlu0 %1045  ;;  %v1050_v60 = vperm.slane %v1521_v14, 0 }
 0x11c   : > { %v1051_v37 = vmul.f32 %v1048_v55, %v1046_v40 }
 0x11d   : > { %v982_v35 = vpop.permute.xlu1 %981  ;;  %v1009_v42 = vadd.f32 1e-05, %v1006_v13 }
 0x11e   : > { %v986_v31 = vsel %vm796_vm10, %v980_v48, %v982_v35  ;;  %v987_v38 = vsel %vm796_vm10, %v982_v35, %v984_v45 }
 0x11f   : > { %v992_v1 = vadd.f32 %v986_v31, %v777_v36  ;;  %v993_v54 = vadd.f32 %v987_v38, %v778_v62  ;;  %1183 = vrsqrt.f32 %v1009_v42  ;;  %vm1018_vm12 = vweird.f32 %v1009_v42 }
 0x121   : > { %v998_v43 = vmul.f32 0.0625, %v992_v1  ;;  %v999_v9 = vmul.f32 0.0625, %v993_v54  ;;  %v1052_v1 = vmul.f32 %v1049_v59, %v1046_v40 }
 0x123   : > { %v1004_v15 = vsub.f32 %v998_v43, %v1001_v6  ;;  %v1005_v16 = vsub.f32 %v999_v9, %v1002_v17  ;;  %v1053_v9 = vmul.f32 %v1050_v60, %v1046_v40 }
 0x125   : > { %v1007_v18 = vmax.f32 %v1004_v15, 0.0  ;;  %v1008_v2 = vmax.f32 %v1005_v16, 0.0  ;;  %v1184_v19 = vpop.eup %1183  ;;  %v344_v22 = vpop.f32.mrf.mxu1 }
 0x126   : > { %v1013_v21 = vmul.f32 %v1184_v19, %v1009_v42  ;;  %v324_v46 = vpop.f32.mrf.mxu0  ;;  %vm1019_vm11 = vweird.f32 %v1184_v19  ;;  %v1067_v36 = vpop.permute.xlu1 %1066 }
 0x127   : > { %v1010_v63 = vadd.f32 1e-05, %v1007_v18  ;;  %v1525_v20 = vadd.f32 1e-05, %v1008_v2  ;;  %v400_v24 = vadd.f32 %v399_v49, %v324_v46  ;;  %vm1020_vm13 = vmor %vm1018_vm12, %vm1019_vm11 }
 0x128   : > { %v1014_v33 = vmul.f32 %v1184_v19, %v1013_v21 }
 0x129   : > { %1185 = vrsqrt.f32 %v1010_v63  ;;  %v364_v25 = vpop.f32.mrf.mxu2  ;;  %vm1028_vm15 = vweird.f32 %v1010_v63  ;;  %vm1038_vm2 = vweird.f32 %v1525_v20 }
 0x12a   : > { %1187 = vrsqrt.f32 %v1525_v20  ;;  %v1015_v39 = vmul.f32 0.5, %v1014_v33 }
 0x12c   : > { %v1016_v50 = vsub.f32 1.5, %v1015_v39 }
 0x12d   : > { %v439_v48 = vpop.f32.mrf.mxu1 }
 0x12e   : > { %v1017_v47 = vmul.f32 %v1184_v19, %v1016_v50  ;;  %v419_v7 = vpop.f32.mrf.mxu0  ;;  %v440_v38 = vadd.f32 %v439_v48, %v364_v25 }
 0x12f   : > { %v1186_v4 = vpop.eup %1185  ;;  %v420_v56 = vadd.f32 %v419_v7, %v344_v22 }
 0x130   : > { %v1023_v23 = vmul.f32 %v1186_v4, %v1010_v63  ;;  %v1528_v3 = vpop.eup %1187  ;;  %v1021_v35 = vsel %vm1020_vm13, %v1184_v19, %v1017_v47  ;;  %vm1029_vm14 = vweird.f32 %v1186_v4 }
 0x131   : > { %v1033_v34 = vmul.f32 %v1528_v3, %v1525_v20  ;;  %v1057_v31 = vperm.slane %v1021_v35, 0  ;;  %vm1536_vm0 = vmor %vm1028_vm15, %vm1029_vm14  ;;  %vm1039_vm1 = vweird.f32 %v1528_v3 }
 0x132   : > { %v1024_v28 = vmul.f32 %v1186_v4, %v1023_v23  ;;  %vm1040_vm3 = vmor %vm1038_vm2, %vm1039_vm1 }
 0x133   : > { %v1034_v41 = vmul.f32 %v1528_v3, %v1033_v34  ;;  %v611_v26 = vpop.f32.mrf.mxu2 }
 0x134   : > { %v1025_v51 = vmul.f32 0.5, %v1024_v28  ;;  %v654_v8 = vadd.f32 %v611_v26, %v400_v24 }
 0x135   : > { %v1035_v52 = vmul.f32 0.5, %v1034_v41 }
 0x136   : > { %v1026_v10 = vsub.f32 1.5, %v1025_v51 }
 0x137   : > { %v1036_v27 = vsub.f32 1.5, %v1035_v52 }
 0x138   : > { %v1027_v58 = vmul.f32 %v1186_v4, %v1026_v10 }
 0x139   : > { %v1037_v0 = vmul.f32 %v1528_v3, %v1036_v27 }
 0x13a   : > { %v1031_v62 = vsel %vm1536_vm0, %v1186_v4, %v1027_v58 }
 0x13b   : > { %v1058_v6 = vperm.slane %v1031_v62, 0  ;;  %v1041_v13 = vsel %vm1040_vm3, %v1528_v3, %v1037_v0 }
 0x13c   : > { %v1059_v18 = vperm.slane %v1041_v13, 0 }
 0x141   : > { %v631_v30 = vpop.f32.mrf.mxu3 }
 0x142   : > { %v655_v11 = vadd.f32 %v631_v30, %v420_v56 }
 0x155   : > { %v826_v5 = vpop.f32.mrf.mxu1 }
 0x156   : > { %v869_v57 = vadd.f32 %v826_v5, %v654_v8 }
 0x158   : > { %v1054_v29 = vsub.f32 %v869_v57, %v1051_v37 }
 0x159   : > { %v866_v54 = vpop.f32.mrf.mxu3 }
 0x15a   : > { %v1060_v45 = vmul.f32 %v1057_v31, %v1054_v29 }
 0x15b   : > { %v846_v61 = vpop.f32.mrf.mxu2 }
 0x15c   : > { %v870_v44 = vadd.f32 %v846_v61, %v655_v11  ;;  %v1069_v12 = vadd.f32 %v1067_v36, %v1060_v45 }
 0x15d   : > { %v651_v53 = vpop.f32.mrf.mxu0 }
 0x15e   : > { %v1055_v43 = vsub.f32 %v870_v44, %v1052_v1  ;;  %1072 = vst [vmem:[%s197_s13] sm:$0xff] %v1069_v12  ;;  %v656_v14 = vadd.f32 %v651_v53, %v440_v38 }
 0x160   : > { %v1061_v15 = vmul.f32 %v1058_v6, %v1055_v43  ;;  %v871_v17 = vadd.f32 %v866_v54, %v656_v14 }
 0x162   : > { %v1070_v42 = vadd.f32 %v1067_v36, %v1061_v15  ;;  %v1056_v16 = vsub.f32 %v871_v17, %v1053_v9 }
 0x164   : > { %1073 = vst [vmem:[%s197_s13 + $0x8] sm:$0xff] %v1070_v42  ;;  %v1062_v2 = vmul.f32 %v1059_v18, %v1056_v16 }
 0x166   : > { %v1071_v63 = vadd.f32 %v1067_v36, %v1062_v2 }
 0x168   : > { %1074 = vst [vmem:[%s197_s13 + $0x10] sm:$0xff] %v1071_v63 }
 0x169 PF: > { %s14_s15 = sadd.s32 1, %s1195_s15  }
 0x16a   : > { %p11_p4 = scmp.ge.s32.totalorder %s14_s15, 4  }
 0x16c   :  { %13 = sbr.rel (!%p11_p4) target bundleno = 1 (0x1), region = 81 }

</bundles_post_ra>
